<compile_context>
chip_gen: v7x
topology: tpu7x:2x2x1
jax: 0.10.0
libtpu: 0.0.40
codegen_flags: <defaults>
</compile_context>

<pallas_src>
import jax
import jax.numpy as jnp
from jax.experimental import pallas as pl
from jax.experimental.pallas import tpu as pltpu


def conv1x1_bn_relu_kernel(w_ref, x_ref, shift_ref, o_ref):
    # w_ref:     (C_out, C_in)  conv weight with BN scale pre-folded
    # x_ref:     (C_in, M_pad)  channels-major activations (lane dim padded to 128k)
    # shift_ref: (C_out, 1)     folded BN shift = beta - mean * scale
    # o_ref:     (C_out, M_pad)
    y = jnp.dot(w_ref[...], x_ref[...], preferred_element_type=jnp.float32)
    y = y + shift_ref[...]
    o_ref[...] = jnp.maximum(y, 0.0).astype(o_ref.dtype)


def conv1x1_bn_relu(x_nchw, w_oi, gamma, beta, running_mean, running_var, eps=1e-5):
    N, C_in, H, W = x_nchw.shape
    C_out = w_oi.shape[0]
    M = N * H * W
    M_pad = ((M + 127) // 128) * 128  # lane-dense output width

    # Channels-major flatten. For N == 1 this is a zero-cost reshape (no transpose).
    if N == 1:
        x_cm = x_nchw.reshape(C_in, M)
    else:
        x_cm = jnp.transpose(x_nchw, (1, 0, 2, 3)).reshape(C_in, M)
    x_pad = jnp.pad(x_cm, ((0, 0), (0, M_pad - M)))

    # Fold BN (inference semantics, running stats) into the weight + a shift vector.
    inv_std = jax.lax.rsqrt(running_var + eps)
    scale = gamma * inv_std                                # (C_out,)
    w_scaled = (w_oi * scale[:, None]).astype(x_nchw.dtype)  # (C_out, C_in)
    shift = (beta - running_mean * scale).reshape(C_out, 1).astype(jnp.float32)

    flops = 2 * M * C_in * C_out
    bytes_accessed = 4 * (C_in * M_pad + C_out * C_in + C_out + C_out * M_pad)

    out_pad = pl.pallas_call(
        conv1x1_bn_relu_kernel,
        out_shape=jax.ShapeDtypeStruct((C_out, M_pad), x_nchw.dtype),
        in_specs=[
            pl.BlockSpec(memory_space=pltpu.MemorySpace.VMEM),
            pl.BlockSpec(memory_space=pltpu.MemorySpace.VMEM),
            pl.BlockSpec(memory_space=pltpu.MemorySpace.VMEM),
        ],
        out_specs=pl.BlockSpec(memory_space=pltpu.MemorySpace.VMEM),
        cost_estimate=pl.CostEstimate(
            flops=flops, transcendentals=0, bytes_accessed=bytes_accessed
        ),
    )(w_scaled, x_pad, shift)

    out = out_pad[:, :M]
    if N == 1:
        return out.reshape(1, C_out, H, W)
    return jnp.transpose(out.reshape(C_out, N, H, W), (1, 0, 2, 3))


def reference(x_nchw, w_oi, gamma, beta, running_mean, running_var, eps=1e-5):
    # pure-JAX reference for sanity checking
    y = jnp.einsum("nchw,oc->nohw", x_nchw, w_oi)
    scale = gamma / jnp.sqrt(running_var + eps)
    shift = beta - running_mean * scale
    y = y * scale[None, :, None, None] + shift[None, :, None, None]
    return jnp.maximum(y, 0.0)


if __name__ == "__main__":
    key = jax.random.PRNGKey(0)
    k_x, k_w, k_g, k_b, k_m, k_v = jax.random.split(key, 6)

    N, C, H, W = 1, 116, 14, 14  # matches the module's conv2d22 (116 -> 116, 1x1)
    x = jax.random.normal(k_x, (N, C, H, W), dtype=jnp.float32)

    # deterministic synthetic parameters
    w = jax.random.normal(k_w, (C, C), dtype=jnp.float32) * 0.05   # Conv2d weight (C_out, C_in)
    gamma = jax.random.normal(k_g, (C,), dtype=jnp.float32) * 0.1 + 1.0
    beta = jax.random.normal(k_b, (C,), dtype=jnp.float32) * 0.1
    running_mean = jax.random.normal(k_m, (C,), dtype=jnp.float32) * 0.1
    running_var = jnp.abs(jax.random.normal(k_v, (C,), dtype=jnp.float32)) * 0.1 + 1.0

    fn = jax.jit(conv1x1_bn_relu)
    out = fn(x, w, gamma, beta, running_mean, running_var)
    out = jax.block_until_ready(out)

    ref = reference(x, w, gamma, beta, running_mean, running_var)
    assert out.shape == (N, C, H, W), out.shape
    assert jnp.allclose(out, ref, atol=1e-4, rtol=1e-4), "mismatch vs reference"

    print("KERNEL_OK")
</pallas_src>

<mosaic_0001>
module attributes {stable_mosaic.version = 11 : i64} {
  func.func @conv1x1_bn_relu_kernel(%arg0: memref<116x116xf32, #tpu.memory_space<vmem>>, %arg1: memref<116x256xf32, #tpu.memory_space<vmem>>, %arg2: memref<116x1xf32, #tpu.memory_space<vmem>>, %arg3: memref<116x256xf32, #tpu.memory_space<vmem>>) attributes {dimension_semantics = [], scalar_prefetch = 0 : i64, scratch_operands = 0 : i64, tpu.core_type = #tpu.core_type<tc>} {
    %c0 = arith.constant 0 : index
    %c0_0 = arith.constant 0 : index
    %0 = vector.load %arg0[%c0, %c0_0] : memref<116x116xf32, #tpu.memory_space<vmem>>, vector<116x116xf32>
    %c0_1 = arith.constant 0 : index
    %c0_2 = arith.constant 0 : index
    %1 = vector.load %arg1[%c0_1, %c0_2] : memref<116x256xf32, #tpu.memory_space<vmem>>, vector<116x256xf32>
    %cst = arith.constant dense<0.000000e+00> : vector<116x256xf32>
    %2 = tpu.matmul %0, %1, %cst {dimension_numbers = #tpu.dot_dimension_numbers<[1], [0], [0], [1], [0, 0, 1, 1], [], []>} : vector<116x116xf32>, vector<116x256xf32>, vector<116x256xf32> -> vector<116x256xf32>
    %c0_3 = arith.constant 0 : index
    %c0_4 = arith.constant 0 : index
    %3 = vector.load %arg2[%c0_3, %c0_4] : memref<116x1xf32, #tpu.memory_space<vmem>>, vector<116x1xf32>
    %4 = vector.broadcast %3 : vector<116x1xf32> to vector<116x256xf32>
    %5 = arith.addf %2, %4 : vector<116x256xf32>
    %cst_5 = arith.constant 0.000000e+00 : f32
    %6 = vector.broadcast %cst_5 : f32 to vector<116x256xf32>
    %7 = arith.maximumf %5, %6 : vector<116x256xf32>
    %c0_6 = arith.constant 0 : index
    %c0_7 = arith.constant 0 : index
    %8 = vector.load %arg3[%c0_6, %c0_7] : memref<116x256xf32, #tpu.memory_space<vmem>>, vector<116x256xf32>
    tpu.vector_store %arg3[%c0_6, %c0_7], %7 {strides = array<i32>} : memref<116x256xf32, #tpu.memory_space<vmem>>, vector<116x256xf32>,
    return
  }
}

</mosaic_0001>

<bundles_post_ra>
// kernel: conv1x1_bn_relu.1
= control target key start
LH: loop header
LB: loop body
LE: loop exit
PB: predicated region body
PF: predicated region fallthrough
CT: control target
= control target key end

     0   :  { %v486_v3 = vmov 0.0   ;;  %v487_v8 = vmov 0   ;;  %vm195_vm0 = vcmask 1043456   ;;  %vm149_vm1 = vcmask 949248   ;;  %s832_s1 = inlined_call_operand.vmem [shape: f32[116,256], index: 1, kind: input, shape index: {}]   ;;  %s833_s2 = inlined_call_operand.vmem [shape: f32[116,1], index: 2, kind: input, shape index: {}]   ;;  %s834_s0 = inlined_call_operand.vmem [shape: f32[116,116], index: 0, kind: input, shape index: {}]   ;;  %s835_s3 = inlined_call_operand.vmem [shape: f32[116,256], index: 3, kind: output, shape index: {}]  }
   0x1   :  { %v30_v0 = vld [vmem:[%s832_s1 + $0x8] sm:$0xff]  ;;  %v32_v1 = vld [vmem:[%s832_s1 + $0x18] sm:$0xff]  ;;  %v29_v2 = vld [vmem:[%s832_s1] sm:$0xff]  ;;  %266 = vmatprep.mubr.f32.mxu0 %v486_v3  ;;  %314 = vmatprep.mubr.f32.mxu1 %v486_v3 }
   0x2   :  { %v438_v4 = vpack.c.bf16 %v32_v1, %v30_v0  ;;  %v31_v5 = vld [vmem:[%s832_s1 + $0x10] sm:$0xff]  ;;  %v34_v6 = vld [vmem:[%s832_s1 + $0x28] sm:$0xff]  ;;  %v36_v7 = vld [vmem:[%s832_s1 + $0x38] sm:$0xff]  ;;  %484 = vset.pattern.permute.xlu0 %v487_v8  ;;  %485 = vset.pattern.permute.xlu1 %v487_v8 }
   0x3   :  { %v440_v9 = vpack.c.bf16 %v31_v5, %v29_v2  ;;  %v442_v10 = vpack.c.bf16 %v36_v7, %v34_v6  ;;  %v33_v11 = vld [vmem:[%s832_s1 + $0x20] sm:$0xff]  ;;  %v35_v12 = vld [vmem:[%s832_s1 + $0x30] sm:$0xff]  ;;  %v38_v13 = vld [vmem:[%s832_s1 + $0x48] sm:$0xff] }
   0x4   :  { %439 = vmatprep.subr.bf16.mxu0 %v438_v4  ;;  %466 = vmatprep.subr.bf16.mxu1 %v438_v4  ;;  %v40_v14 = vld [vmem:[%s832_s1 + $0x58] sm:$0xff]  ;;  %v444_v15 = vpack.c.bf16 %v35_v12, %v33_v11  ;;  %v37_v17 = vld [vmem:[%s832_s1 + $0x40] sm:$0xff]  ;;  %v39_v18 = vld [vmem:[%s832_s1 + $0x50] sm:$0xff] }
   0x5   :  { %441 = vmatpush1.bf16.msra.mxu0 %v440_v9  ;;  %474 = vmatpush1.bf16.msra.mxu1 %v440_v9  ;;  %v446_v16 = vpack.c.bf16 %v40_v14, %v38_v13  ;;  %v42_v19 = vld [vmem:[%s832_s1 + $0x68] sm:$0xff]  ;;  %v44_v20 = vld [vmem:[%s832_s1 + $0x78] sm:$0xff]  ;;  %v448_v21 = vpack.c.bf16 %v39_v18, %v37_v17  ;;  %v41_v23 = vld [vmem:[%s832_s1 + $0x60] sm:$0xff] }
   0x6   :  { %443 = vmatprep.subr.bf16.mxu0 %v442_v10  ;;  %467 = vmatprep.subr.bf16.mxu1 %v442_v10  ;;  %v450_v22 = vpack.c.bf16 %v44_v20, %v42_v19  ;;  %v43_v24 = vld [vmem:[%s832_s1 + $0x70] sm:$0xff]  ;;  %v46_v25 = vld [vmem:[%s832_s1 + $0x88] sm:$0xff]  ;;  %v48_v26 = vld [vmem:[%s832_s1 + $0x98] sm:$0xff] }
   0x7   :  { %v452_v27 = vpack.c.bf16 %v43_v24, %v41_v23  ;;  %v454_v28 = vpack.c.bf16 %v48_v26, %v46_v25  ;;  %v45_v29 = vld [vmem:[%s832_s1 + $0x80] sm:$0xff]  ;;  %v47_v30 = vld [vmem:[%s832_s1 + $0x90] sm:$0xff]  ;;  %v50_v31 = vld [vmem:[%s832_s1 + $0xa8] sm:$0xff] }
   0x8   :  { %v52_v32 = vld [vmem:[%s832_s1 + $0xb8] sm:$0xff]  ;;  %v59_v33 = vld [vmem:[%s833_s2] sm:$0xff]  ;;  %v61_v34 = vld [vmem:[%s833_s2 + $0x10] sm:$0xff]  ;;  %v456_v35 = vpack.c.bf16 %v47_v30, %v45_v29 }
   0x9   :  { %445 = vmatpush1.bf16.msra.mxu0 %v444_v15  ;;  %475 = vmatpush1.bf16.msra.mxu1 %v444_v15  ;;  %v458_v36 = vpack.c.bf16 %v52_v32, %v50_v31  ;;  %v49_v37 = vld [vmem:[%s832_s1 + $0xa0] sm:$0xff]  ;;  %v51_v38 = vld [vmem:[%s832_s1 + $0xb0] sm:$0xff]  ;;  %v54_v39 = vld [vmem:[%s832_s1 + $0xc8] sm:$0xff] }
   0xa   :  { %447 = vmatprep.subr.bf16.mxu0 %v446_v16  ;;  %468 = vmatprep.subr.bf16.mxu1 %v446_v16  ;;  %v56_v40 = vld [vmem:[%s832_s1 + $0xd8] sm:$0xff]  ;;  %v60_v41 = vld [vmem:[%s833_s2 + $0x8] sm:$0xff]  ;;  %v460_v43 = vpack.c.bf16 %v51_v38, %v49_v37  ;;  %v53_v45 = vld [vmem:[%s832_s1 + $0xc0] sm:$0xff] }
   0xb   :  { %76 = vperm.xlu0 %484, %v59_v33   ;;  %86 = vperm.xlu1 %485, %v61_v34   ;;  %v62_v42 = vld [vmem:[%s833_s2 + $0x18] sm:$0xff]  ;;  %v462_v44 = vpack.c.bf16 %v56_v40, %v54_v39  ;;  %v55_v46 = vld [vmem:[%s832_s1 + $0xd0] sm:$0xff]  ;;  %v63_v47 = vld [vmem:[%s833_s2 + $0x20] sm:$0xff] }
   0xc   :  { %v64_v48 = vld [vmem:[%s833_s2 + $0x28] sm:$0xff]  ;;  %v464_v49 = vpack.c.bf16 %v55_v46, %v53_v45  ;;  %v65_v51 = vld [vmem:[%s833_s2 + $0x30] sm:$0xff]  ;;  %v66_v52 = vld [vmem:[%s833_s2 + $0x38] sm:$0xff] }
   0xd   :  { %449 = vmatpush1.bf16.msra.mxu0 %v448_v21  ;;  %476 = vmatpush1.bf16.msra.mxu1 %v448_v21  ;;  %v58_v50 = vld [vmem:[%s832_s1 + $0xe8] sm:$0xf]  ;;  %v57_v53 = vld [vmem:[%s832_s1 + $0xe0] sm:$0xf]  ;;  %v69_v60 = vld [vmem:[%s833_s2 + $0x50] sm:$0xff] }
   0xe   :  { %451 = vmatprep.subr.bf16.mxu0 %v450_v22  ;;  %469 = vmatprep.subr.bf16.mxu1 %v450_v22  ;;  %v14_v54 = vld [vmem:[%s834_s0] sm:$0xff]  ;;  %v68_v57 = vld [vmem:[%s833_s2 + $0x48] sm:$0xff]  ;;  %v70_v61 = vld [vmem:[%s833_s2 + $0x58] sm:$0xff] }
   0xf   :  { %81 = vperm.xlu0 %484, %v60_v41   ;;  %91 = vperm.xlu1 %485, %v62_v42   ;;  %v22_v55 = vld [vmem:[%s834_s0 + $0x40] sm:$0xff]  ;;  %v15_v58 = vld [vmem:[%s834_s0 + $0x8] sm:$0xff]  ;;  %v16_v62 = vld [vmem:[%s834_s0 + $0x10] sm:$0xff] }
  0x10   :  { %v67_v56 = vld [vmem:[%s833_s2 + $0x40] sm:$0xff]  ;;  %v23_v59 = vld [vmem:[%s834_s0 + $0x48] sm:$0xff]  ;;  %v24_v63 = vld [vmem:[%s834_s0 + $0x50] sm:$0xff] }
  0x11   :  { %453 = vmatpush1.bf16.msra.mxu0 %v452_v27  ;;  %477 = vmatpush1.bf16.msra.mxu1 %v452_v27  ;;  %v71_v0 = vld [vmem:[%s833_s2 + $0x60] sm:$0xff]  ;;  %v72_v1 = vld [vmem:[%s833_s2 + $0x68] sm:$0xff]  ;;  %v17_v2 = vld [vmem:[%s834_s0 + $0x18] sm:$0xff] }
  0x12   :  { %455 = vmatprep.subr.bf16.mxu0 %v454_v28  ;;  %470 = vmatprep.subr.bf16.mxu1 %v454_v28  ;;  %v25_v4 = vld [vmem:[%s834_s0 + $0x58] sm:$0xff]  ;;  %v73_v5 = vld [vmem:[%s833_s2 + $0x70] sm:$0xf]  ;;  %v18_v6 = vld [vmem:[%s834_s0 + $0x20] sm:$0xff] }
  0x13   :  { %96 = vperm.xlu0 %484, %v63_v47   ;;  %101 = vperm.xlu1 %485, %v64_v48   ;;  %v26_v7 = vld [vmem:[%s834_s0 + $0x60] sm:$0xff]  ;;  %v19_v8 = vld [vmem:[%s834_s0 + $0x28] sm:$0xff]  ;;  %v20_v10 = vld [vmem:[%s834_s0 + $0x30] sm:$0xff] }
  0x14   :  { %v27_v9 = vld [vmem:[%s834_s0 + $0x68] sm:$0xff]  ;;  %v28_v11 = vld [vmem:[%s834_s0 + $0x70] sm:$0xf]  ;;  %v21_v12 = vld [vmem:[%s834_s0 + $0x38] sm:$0xff] }
  0x15   :  { %457 = vmatpush1.bf16.msra.mxu0 %v456_v35  ;;  %478 = vmatpush1.bf16.msra.mxu1 %v456_v35 }
  0x16   :  { %459 = vmatprep.subr.bf16.mxu0 %v458_v36  ;;  %471 = vmatprep.subr.bf16.mxu1 %v458_v36 }
  0x17   :  { %106 = vperm.xlu0 %484, %v65_v51   ;;  %111 = vperm.xlu1 %485, %v66_v52  }
  0x19   :  { %461 = vmatpush1.bf16.msra.mxu0 %v460_v43  ;;  %479 = vmatpush1.bf16.msra.mxu1 %v460_v43 }
  0x1a   :  { %463 = vmatprep.subr.bf16.mxu0 %v462_v44  ;;  %472 = vmatprep.subr.bf16.mxu1 %v462_v44 }
  0x1b   :  { %116 = vperm.xlu0 %484, %v67_v56   ;;  %121 = vperm.xlu1 %485, %v68_v57  }
  0x1d   :  { %465 = vmatpush1.bf16.msra.mxu0 %v464_v49  ;;  %480 = vmatpush1.bf16.msra.mxu1 %v464_v49 }
  0x1e   :  { %421 = vmatprep.subr.msk.mxu0 %vm195_vm0, %v58_v50  ;;  %473 = vmatprep.subr.msk.mxu1 %vm195_vm0, %v58_v50 }
  0x1f   :  { %126 = vperm.xlu0 %484, %v69_v60   ;;  %131 = vperm.xlu1 %485, %v70_v61  }
  0x21   :  { %422 = vmatpush1.msk.msra.mxu0 %vm195_vm0, %v57_v53  ;;  %481 = vmatpush1.msk.msra.mxu1 %vm195_vm0, %v57_v53 }
  0x22   :  { %423 = vmatmul.mubr.msk.f32.vlgmr.msra.gmra.mrb[0].mxu0 %vm149_vm1, %v14_v54  ;;  %431 = vmatmul.mubr.msk.f32.vlgmr.msra.gmra.mrb[0].mxu1 %vm149_vm1, %v22_v55 }
  0x23   :  { %272 = vmatprep.mubr.f32.mxu0 %v486_v3  ;;  %320 = vmatprep.mubr.f32.mxu1 %v486_v3 }
  0x24   :  { %136 = vperm.xlu0 %484, %v71_v0   ;;  %141 = vperm.xlu1 %485, %v72_v1  }
  0x26   :  { %424 = vmatmul.mubr.msk.f32.gmra.mrb[2].mxu0 %vm149_vm1, %v15_v58  ;;  %432 = vmatmul.mubr.msk.f32.gmra.mrb[2].mxu1 %vm149_vm1, %v23_v59 }
  0x27   :  { %278 = vmatprep.mubr.f32.mxu0 %v486_v3  ;;  %326 = vmatprep.mubr.f32.mxu1 %v486_v3 }
  0x28   :  { %146 = vperm.xlu0 %484, %v73_v5  }
  0x2a   :  { %425 = vmatmul.mubr.msk.f32.gmra.mrb[4].mxu0 %vm149_vm1, %v16_v62  ;;  %433 = vmatmul.mubr.msk.f32.gmra.mrb[4].mxu1 %vm149_vm1, %v24_v63 }
  0x2b   :  { %284 = vmatprep.mubr.f32.mxu0 %v486_v3  ;;  %332 = vmatprep.mubr.f32.mxu1 %v486_v3 }
  0x2e   :  { %426 = vmatmul.mubr.msk.f32.gmra.mrb[6].mxu0 %vm149_vm1, %v17_v2  ;;  %434 = vmatmul.mubr.msk.f32.gmra.mrb[6].mxu1 %vm149_vm1, %v25_v4 }
  0x2f   :  { %290 = vmatprep.mubr.f32.mxu0 %v486_v3  ;;  %338 = vmatprep.mubr.f32.mxu1 %v486_v3 }
  0x32   :  { %427 = vmatmul.mubr.msk.f32.gmra.mrb[8].mxu0 %vm149_vm1, %v18_v6  ;;  %435 = vmatmul.mubr.msk.f32.gmra.mrb[8].mxu1 %vm149_vm1, %v26_v7 }
  0x33   :  { %296 = vmatprep.mubr.f32.mxu0 %v486_v3  ;;  %344 = vmatprep.mubr.f32.mxu1 %v486_v3 }
  0x36   :  { %428 = vmatmul.mubr.msk.f32.gmra.mrb[10].mxu0 %vm149_vm1, %v19_v8  ;;  %436 = vmatmul.mubr.msk.f32.gmra.mrb[10].mxu1 %vm149_vm1, %v27_v9 }
  0x37   :  { %302 = vmatprep.mubr.f32.mxu0 %v486_v3  ;;  %350 = vmatprep.mubr.f32.mxu1 %v486_v3 }
  0x3a   :  { %429 = vmatmul.mubr.msk.f32.gmra.mrb[12].mxu0 %vm149_vm1, %v20_v10  ;;  %437 = vmatmul.mubr.msk.f32.gmra.mrb[12].mxu1 %vm149_vm1, %v28_v11 }
  0x3b   :  { %308 = vmatprep.mubr.f32.mxu0 %v486_v3 }
  0x3e   :  { %430 = vmatmul.mubr.msk.f32.gmra.mrb[14].mxu0 %vm149_vm1, %v21_v12 }
  0x8a   :  { %v77_v13 = vpop.permute.xlu0 %76  ;;  %v87_v14 = vpop.permute.xlu1 %86 }
  0x8e   :  { %v82_v15 = vpop.permute.xlu0 %81  ;;  %v722_v16 = vpop.permute.xlu1 %91 }
  0x92   :  { %v724_v17 = vpop.permute.xlu0 %96  ;;  %v726_v18 = vpop.permute.xlu1 %101 }
  0x96   :  { %v728_v19 = vpop.permute.xlu0 %106  ;;  %v730_v20 = vpop.permute.xlu1 %111 }
  0x9a   :  { %v117_v3 = vpop.permute.xlu0 %116  ;;  %v122_v29 = vpop.permute.xlu1 %121 }
  0x9e   :  { %v127_v42 = vpop.permute.xlu0 %126  ;;  %v132_v55 = vpop.permute.xlu1 %131 }
  0xa3   :  { %v137_v5 = vpop.permute.xlu0 %136 }
  0xf5   :  { %v268_v21 = vpop.f32.mrb[0].mxu0  ;;  %v316_v22 = vpop.f32.mrb[0].mxu1 }
  0xf6   :  { %v269_v23 = vadd.f32 %v268_v21, %v77_v13  ;;  %v317_v24 = vadd.f32 %v316_v22, %v117_v3  ;;  %v270_v25 = vpop.f32.mrb[1].mxu0  ;;  %v318_v26 = vpop.f32.mrb[1].mxu1 }
  0xf7   :  { %v271_v27 = vadd.f32 %v270_v25, %v77_v13  ;;  %v319_v28 = vadd.f32 %v318_v26, %v117_v3  ;;  %v142_v21 = vpop.permute.xlu1 %141 }
  0xf8   :  { %v357_v30 = vmax.f32 %v269_v23, 0.0  ;;  %v373_v31 = vmax.f32 %v317_v24, 0.0 }
  0xf9   :  { %v358_v32 = vmax.f32 %v271_v27, 0.0  ;;  %v374_v33 = vmax.f32 %v319_v28, 0.0  ;;  %v274_v34 = vpop.f32.mrb[2].mxu0  ;;  %v322_v35 = vpop.f32.mrb[2].mxu1 }
  0xfa   :  { %387 = vst [vmem:[%s835_s3] sm:$0xff] %v357_v30  ;;  %403 = vst [vmem:[%s835_s3 + $0x80] sm:$0xff] %v373_v31  ;;  %v275_v36 = vadd.f32 %v274_v34, %v82_v15  ;;  %v323_v37 = vadd.f32 %v322_v35, %v122_v29  ;;  %v276_v38 = vpop.f32.mrb[3].mxu0  ;;  %v324_v39 = vpop.f32.mrb[3].mxu1 }
  0xfb   :  { %388 = vst [vmem:[%s835_s3 + $0x8] sm:$0xff] %v358_v32  ;;  %404 = vst [vmem:[%s835_s3 + $0x88] sm:$0xff] %v374_v33  ;;  %v277_v40 = vadd.f32 %v276_v38, %v82_v15  ;;  %v325_v41 = vadd.f32 %v324_v39, %v122_v29  ;;  %v147_v33 = vpop.permute.xlu0 %146 }
  0xfc   :  { %v359_v43 = vmax.f32 %v275_v36, 0.0  ;;  %v375_v44 = vmax.f32 %v323_v37, 0.0 }
  0xfd   :  { %v360_v45 = vmax.f32 %v277_v40, 0.0  ;;  %v376_v46 = vmax.f32 %v325_v41, 0.0  ;;  %v280_v47 = vpop.f32.mrb[4].mxu0  ;;  %v328_v48 = vpop.f32.mrb[4].mxu1 }
  0xfe   :  { %389 = vst [vmem:[%s835_s3 + $0x10] sm:$0xff] %v359_v43  ;;  %405 = vst [vmem:[%s835_s3 + $0x90] sm:$0xff] %v375_v44  ;;  %v281_v49 = vadd.f32 %v280_v47, %v87_v14  ;;  %v329_v50 = vadd.f32 %v328_v48, %v127_v42  ;;  %v282_v51 = vpop.f32.mrb[5].mxu0  ;;  %v330_v52 = vpop.f32.mrb[5].mxu1 }
  0xff   :  { %390 = vst [vmem:[%s835_s3 + $0x18] sm:$0xff] %v360_v45  ;;  %406 = vst [vmem:[%s835_s3 + $0x98] sm:$0xff] %v376_v46  ;;  %v283_v53 = vadd.f32 %v282_v51, %v87_v14  ;;  %v331_v54 = vadd.f32 %v330_v52, %v127_v42 }
 0x100   :  { %v361_v56 = vmax.f32 %v281_v49, 0.0  ;;  %v377_v57 = vmax.f32 %v329_v50, 0.0 }
 0x101   :  { %v362_v58 = vmax.f32 %v283_v53, 0.0  ;;  %v378_v59 = vmax.f32 %v331_v54, 0.0  ;;  %v286_v60 = vpop.f32.mrb[6].mxu0  ;;  %v334_v61 = vpop.f32.mrb[6].mxu1 }
 0x102   :  { %391 = vst [vmem:[%s835_s3 + $0x20] sm:$0xff] %v361_v56  ;;  %407 = vst [vmem:[%s835_s3 + $0xa0] sm:$0xff] %v377_v57  ;;  %v287_v62 = vadd.f32 %v286_v60, %v722_v16  ;;  %v335_v63 = vadd.f32 %v334_v61, %v132_v55  ;;  %v288_v0 = vpop.f32.mrb[7].mxu0  ;;  %v336_v1 = vpop.f32.mrb[7].mxu1 }
 0x103   :  { %392 = vst [vmem:[%s835_s3 + $0x28] sm:$0xff] %v362_v58  ;;  %408 = vst [vmem:[%s835_s3 + $0xa8] sm:$0xff] %v378_v59  ;;  %v289_v2 = vadd.f32 %v288_v0, %v722_v16  ;;  %v337_v4 = vadd.f32 %v336_v1, %v132_v55 }
 0x104   :  { %v363_v6 = vmax.f32 %v287_v62, 0.0  ;;  %v379_v7 = vmax.f32 %v335_v63, 0.0 }
 0x105   :  { %v364_v8 = vmax.f32 %v289_v2, 0.0  ;;  %v380_v9 = vmax.f32 %v337_v4, 0.0  ;;  %v292_v10 = vpop.f32.mrb[8].mxu0  ;;  %v340_v11 = vpop.f32.mrb[8].mxu1 }
 0x106   :  { %393 = vst [vmem:[%s835_s3 + $0x30] sm:$0xff] %v363_v6  ;;  %409 = vst [vmem:[%s835_s3 + $0xb0] sm:$0xff] %v379_v7  ;;  %v293_v12 = vadd.f32 %v292_v10, %v724_v17  ;;  %v341_v13 = vadd.f32 %v340_v11, %v137_v5  ;;  %v294_v14 = vpop.f32.mrb[9].mxu0  ;;  %v342_v15 = vpop.f32.mrb[9].mxu1 }
 0x107   :  { %394 = vst [vmem:[%s835_s3 + $0x38] sm:$0xff] %v364_v8  ;;  %410 = vst [vmem:[%s835_s3 + $0xb8] sm:$0xff] %v380_v9  ;;  %v295_v16 = vadd.f32 %v294_v14, %v724_v17  ;;  %v343_v3 = vadd.f32 %v342_v15, %v137_v5 }
 0x108   :  { %v365_v22 = vmax.f32 %v293_v12, 0.0  ;;  %v381_v23 = vmax.f32 %v341_v13, 0.0 }
 0x109   :  { %v366_v24 = vmax.f32 %v295_v16, 0.0  ;;  %v382_v25 = vmax.f32 %v343_v3, 0.0  ;;  %v298_v26 = vpop.f32.mrb[10].mxu0  ;;  %v346_v27 = vpop.f32.mrb[10].mxu1 }
 0x10a   :  { %395 = vst [vmem:[%s835_s3 + $0x40] sm:$0xff] %v365_v22  ;;  %411 = vst [vmem:[%s835_s3 + $0xc0] sm:$0xff] %v381_v23  ;;  %v299_v28 = vadd.f32 %v298_v26, %v726_v18  ;;  %v347_v29 = vadd.f32 %v346_v27, %v142_v21  ;;  %v300_v17 = vpop.f32.mrb[11].mxu0  ;;  %v348_v30 = vpop.f32.mrb[11].mxu1 }
 0x10b   :  { %396 = vst [vmem:[%s835_s3 + $0x48] sm:$0xff] %v366_v24  ;;  %412 = vst [vmem:[%s835_s3 + $0xc8] sm:$0xff] %v382_v25  ;;  %v301_v31 = vadd.f32 %v300_v17, %v726_v18  ;;  %v349_v32 = vadd.f32 %v348_v30, %v142_v21 }
 0x10c   :  { %v367_v34 = vmax.f32 %v299_v28, 0.0  ;;  %v383_v35 = vmax.f32 %v347_v29, 0.0 }
 0x10d   :  { %v368_v36 = vmax.f32 %v301_v31, 0.0  ;;  %v384_v37 = vmax.f32 %v349_v32, 0.0  ;;  %v304_v38 = vpop.f32.mrb[12].mxu0  ;;  %v352_v39 = vpop.f32.mrb[12].mxu1 }
 0x10e   :  { %397 = vst [vmem:[%s835_s3 + $0x50] sm:$0xff] %v367_v34  ;;  %413 = vst [vmem:[%s835_s3 + $0xd0] sm:$0xff] %v383_v35  ;;  %v305_v40 = vadd.f32 %v304_v38, %v728_v19  ;;  %v353_v41 = vadd.f32 %v352_v39, %v147_v33  ;;  %v306_v18 = vpop.f32.mrb[13].mxu0  ;;  %v354_v42 = vpop.f32.mrb[13].mxu1 }
 0x10f   :  { %398 = vst [vmem:[%s835_s3 + $0x58] sm:$0xff] %v368_v36  ;;  %414 = vst [vmem:[%s835_s3 + $0xd8] sm:$0xff] %v384_v37  ;;  %v307_v43 = vadd.f32 %v306_v18, %v728_v19  ;;  %v355_v44 = vadd.f32 %v354_v42, %v147_v33 }
 0x110   :  { %v369_v45 = vmax.f32 %v305_v40, 0.0  ;;  %v385_v46 = vmax.f32 %v353_v41, 0.0 }
 0x111   :  { %v370_v47 = vmax.f32 %v307_v43, 0.0  ;;  %v386_v48 = vmax.f32 %v355_v44, 0.0  ;;  %v310_v49 = vpop.f32.mrb[14].mxu0 }
 0x112   :  { %399 = vst [vmem:[%s835_s3 + $0x60] sm:$0xff] %v369_v45  ;;  %415 = vst [vmem:[%s835_s3 + $0xe0] sm:$0xf] %v385_v46  ;;  %v311_v50 = vadd.f32 %v310_v49, %v730_v20  ;;  %v312_v51 = vpop.f32.mrb[15].mxu0 }
 0x113   :  { %400 = vst [vmem:[%s835_s3 + $0x68] sm:$0xff] %v370_v47  ;;  %416 = vst [vmem:[%s835_s3 + $0xe8] sm:$0xf] %v386_v48  ;;  %v313_v19 = vadd.f32 %v312_v51, %v730_v20 }
 0x114   :  { %v371_v52 = vmax.f32 %v311_v50, 0.0 }
 0x115   :  { %v372_v53 = vmax.f32 %v313_v19, 0.0 }
 0x116   :  { %401 = vst [vmem:[%s835_s3 + $0x70] sm:$0xff] %v371_v52 }
 0x117   :  { %402 = vst [vmem:[%s835_s3 + $0x78] sm:$0xff] %v372_v53 }

</bundles_post_ra>
